<compile_context>
chip_gen: v7x
topology: tpu7x:2x2x1
jax: 0.10.0
libtpu: 0.0.40
codegen_flags: <defaults>
</compile_context>

<pallas_src>
import jax
import jax.numpy as jnp
from jax import lax
from jax.experimental import pallas as pl
from jax.experimental.pallas import tpu as pltpu

# ----------------------------- model dimensions ------------------------------
Z_DIM = 32                       # latent noise dim
N_CAT = 8                        # categorical code (one-hot)
S_DIM = 4                        # continuous structured code
IN_DIM = Z_DIM + N_CAT + S_DIM   # 44: conceptual generator fan-in (init scale)
HID = 64                         # hidden width (shared by gen / disc)
GEX_DIM = 128                    # generated gene-expression vector length (lane-dense)
HEAD_DIM = 1 + N_CAT + S_DIM     # validity | categorical | S  = 13

# lane-dense padded dims (zero padding; padded lanes stay exactly 0 end-to-end)
PACK_IN = 128                    # packed [z | cat | s | 0...] generator input
HID_PAD = 128                    # hidden padded to a full 128-lane tile
HEAD_PAD = 128                   # fused head width
W_BLOCKS = 4                     # gen L1, gen L2, disc L1, fused heads

TILE_B = 128                     # batch rows per grid step when gridding large batches


# ------------------------------- Pallas kernel -------------------------------
def infogan_kernel(x_ref, w_ref, b_ref, gen_ref, head_ref):
    """x_ref: [tb, 128] bf16 | w_ref: [4, 128, 128] bf16 | b_ref: [4, 128] f32."""
    x = x_ref[...]                                   # packed [z|cat|s|0], already bf16
    b = b_ref[...]                                   # all biases, f32

    # ----- generator layer 1: single K=128 MXU pass (replaces 3 narrow dots) -----
    h_g = jnp.dot(x, w_ref[0], preferred_element_type=jnp.float32) + b[0:1, :]
    h_g = jnp.maximum(h_g, 0.0)                      # ReLU (f32); pad lanes stay 0

    # ----- generator layer 2 -> gexs -----
    gen = jnp.dot(h_g.astype(jnp.bfloat16), w_ref[1],
                  preferred_element_type=jnp.float32) + b[1:2, :]
    gen_ref[...] = gen                               # lane-dense [tb, 128] f32 store

    # ----- discriminator trunk -----
    h_d = jnp.dot(gen.astype(jnp.bfloat16), w_ref[2],
                  preferred_element_type=jnp.float32) + b[2:3, :]
    h_d = jnp.maximum(h_d, 0.0)                      # ReLU (f32); pad lanes stay 0

    # ----- fused heads: ONE lane-dense [tb, 128] matmul -----
    head = jnp.dot(h_d.astype(jnp.bfloat16), w_ref[3],
                   preferred_element_type=jnp.float32) + b[3:4, :]

    # Lane layout: [0]=validity logit, [1..N_CAT]=categorical logits,
    # [1+N_CAT..HEAD_DIM)=S code, rest zero padding.
    lane = lax.broadcasted_iota(jnp.int32, head.shape, 1)
    is_valid = lane == 0
    is_cat = (lane >= 1) & (lane < 1 + N_CAT)
    is_s = (lane >= 1 + N_CAT) & (lane < HEAD_DIM)

    # Exact sigmoid (VPU/EUP have slack here; exact keeps validity strictly in [0,1]).
    sig = 1.0 / (1.0 + jnp.exp(-head))

    # Masked softmax over the categorical lanes only; exact division for sum==1.
    neg_big = jnp.float32(-1e30)
    c_masked = jnp.where(is_cat, head, neg_big)
    c_max = jnp.max(c_masked, axis=-1, keepdims=True)
    c_exp = jnp.where(is_cat, jnp.exp(c_masked - c_max), 0.0)
    c_prob = c_exp / jnp.sum(c_exp, axis=-1, keepdims=True)

    out = jnp.where(is_valid, sig,
                    jnp.where(is_cat, c_prob,
                              jnp.where(is_s, head, 0.0)))
    head_ref[...] = out                              # single unmasked 128-lane store


# --------------------------------- wrapper -----------------------------------
def _pack_inputs(z, cat, s):
    """Pack [z | cat_onehot | s | zeros] into a lane-dense [B, 128] bf16 buffer."""
    batch = z.shape[0]
    pad = jnp.zeros((batch, PACK_IN - IN_DIM), jnp.float32)
    x = jnp.concatenate(
        [z.astype(jnp.float32), cat.astype(jnp.float32), s.astype(jnp.float32), pad],
        axis=1)
    return x.astype(jnp.bfloat16)


def infogan_forward(z_code, categorical_onehot, s_code, params, *, tile_b=TILE_B):
    batch = z_code.shape[0]
    x = _pack_inputs(z_code, categorical_onehot, s_code)
    w, b = params["w"], params["b"]

    if batch <= tile_b:
        # Small batch: single invocation, no grid, whole-array VMEM residency.
        gen, head = pl.pallas_call(
            infogan_kernel,
            out_shape=(jax.ShapeDtypeStruct((batch, GEX_DIM), jnp.float32),
                       jax.ShapeDtypeStruct((batch, HEAD_PAD), jnp.float32)),
            in_specs=[pl.BlockSpec(memory_space=pltpu.MemorySpace.VMEM)] * 3,
            out_specs=(pl.BlockSpec(memory_space=pltpu.MemorySpace.VMEM),
                       pl.BlockSpec(memory_space=pltpu.MemorySpace.VMEM)),
        )(x, w, b)
    else:
        # Large batch: tile the batch axis; "parallel" lets v7x use both TensorCores.
        padded = pl.cdiv(batch, tile_b) * tile_b
        if padded != batch:
            x = jnp.concatenate(
                [x, jnp.zeros((padded - batch, PACK_IN), x.dtype)], axis=0)
        gen, head = pl.pallas_call(
            infogan_kernel,
            grid=(padded // tile_b,),
            in_specs=[pl.BlockSpec((tile_b, PACK_IN), lambda i: (i, 0)),
                      pl.BlockSpec((W_BLOCKS, 128, 128), lambda i: (0, 0, 0)),
                      pl.BlockSpec((W_BLOCKS, 128), lambda i: (0, 0))],
            out_specs=(pl.BlockSpec((tile_b, GEX_DIM), lambda i: (i, 0)),
                       pl.BlockSpec((tile_b, HEAD_PAD), lambda i: (i, 0))),
            out_shape=(jax.ShapeDtypeStruct((padded, GEX_DIM), jnp.float32),
                       jax.ShapeDtypeStruct((padded, HEAD_PAD), jnp.float32)),
            compiler_params=pltpu.CompilerParams(
                dimension_semantics=("parallel",)),
        )(x, w, b)
        gen, head = gen[:batch], head[:batch]

    # Cheap static slices of the lane-dense fused head output.
    return dict(
        generated=gen,
        validity=head[:, 0:1],
        categorical=head[:, 1:1 + N_CAT],
        S=head[:, 1 + N_CAT:HEAD_DIM],
    )


# ------------------------------- param init ----------------------------------
def init_params(key):
    def lin(k, fan_in, fan_out):
        kw, kb = jax.random.split(k)
        bound = 1.0 / jnp.sqrt(jnp.float32(fan_in))
        w = jax.random.uniform(kw, (fan_in, fan_out), jnp.float32, -bound, bound)
        bvec = jax.random.uniform(kb, (fan_out,), jnp.float32, -bound, bound)
        return w, bvec

    keys = jax.random.split(key, 6)
    gw1, gb1 = lin(keys[0], IN_DIM, HID)       # generator L1 on concat(z, cat, s)
    gw2, gb2 = lin(keys[1], HID, GEX_DIM)      # generator L2
    dw1, db1 = lin(keys[2], GEX_DIM, HID)      # discriminator trunk
    dwv, dbv = lin(keys[3], HID, 1)            # validity head
    dwc, dbc = lin(keys[4], HID, N_CAT)        # categorical head
    dws, dbs = lin(keys[5], HID, S_DIM)        # continuous-code head

    dwh = jnp.concatenate([dwv, dwc, dws], axis=1)     # [HID, 13] fused heads
    dbh = jnp.concatenate([dbv, dbc, dbs], axis=0)     # [13]

    def pad2(wmat, rows, cols):
        out = jnp.zeros((rows, cols), jnp.float32)
        return out.at[:wmat.shape[0], :wmat.shape[1]].set(wmat)

    def pad1(bvec, cols):
        out = jnp.zeros((cols,), jnp.float32)
        return out.at[:bvec.shape[0]].set(bvec)

    # One bf16 weight stack: every block is a uniform, zero-padded 128x128 MXU tile.
    w_packed = jnp.stack([
        pad2(gw1, PACK_IN, HID_PAD),     # [44, 64]  -> [128, 128]
        pad2(gw2, HID_PAD, GEX_DIM),     # [64, 128] -> [128, 128]
        pad2(dw1, GEX_DIM, HID_PAD),     # [128, 64] -> [128, 128]
        pad2(dwh, HID_PAD, HEAD_PAD),    # [64, 13]  -> [128, 128]
    ]).astype(jnp.bfloat16)

    # One f32 bias stack (epilogue math stays f32; v5e has no bf16 VPU/EUP).
    b_packed = jnp.stack([
        pad1(gb1, HID_PAD), pad1(gb2, GEX_DIM),
        pad1(db1, HID_PAD), pad1(dbh, HEAD_PAD),
    ])

    return dict(w=w_packed, b=b_packed)


# ------------------------------ pure-JAX reference ----------------------------
def reference_forward(z, cat, s, params):
    x = _pack_inputs(z, cat, s)
    w, b = params["w"], params["b"]
    f32 = jnp.float32
    h_g = jnp.maximum(jnp.dot(x, w[0], preferred_element_type=f32) + b[0], 0.0)
    gen = jnp.dot(h_g.astype(jnp.bfloat16), w[1], preferred_element_type=f32) + b[1]
    h_d = jnp.maximum(
        jnp.dot(gen.astype(jnp.bfloat16), w[2], preferred_element_type=f32) + b[2], 0.0)
    head = jnp.dot(h_d.astype(jnp.bfloat16), w[3], preferred_element_type=f32) + b[3]
    return dict(
        generated=gen,
        validity=jax.nn.sigmoid(head[:, 0:1]),
        categorical=jax.nn.softmax(head[:, 1:1 + N_CAT], axis=-1),
        S=head[:, 1 + N_CAT:HEAD_DIM],
    )


# ---------------------------------- main --------------------------------------
if __name__ == "__main__":
    key = jax.random.PRNGKey(0)
    k_params, k_z, k_cat, k_s = jax.random.split(key, 4)

    params = init_params(k_params)

    BATCH = 8
    z_code = jax.random.normal(k_z, (BATCH, Z_DIM), jnp.float32)
    cat_idx = jax.random.randint(k_cat, (BATCH,), 0, N_CAT)
    categorical = jax.nn.one_hot(cat_idx, N_CAT, dtype=jnp.float32)
    s_code = jax.random.uniform(k_s, (BATCH, S_DIM), jnp.float32, -1.0, 1.0)

    result = infogan_forward(z_code, categorical, s_code, params)
    jax.block_until_ready(result)

    assert result["generated"].shape == (BATCH, GEX_DIM)
    assert result["validity"].shape == (BATCH, 1)
    assert result["categorical"].shape == (BATCH, N_CAT)
    assert result["S"].shape == (BATCH, S_DIM)

    # softmax rows sum to 1 (exact division in-kernel), validity is a probability
    assert jnp.allclose(jnp.sum(result["categorical"], axis=-1), 1.0, atol=1e-3)
    assert bool(jnp.all((result["validity"] >= 0.0) & (result["validity"] <= 1.0)))

    # match the pure-JAX reference (same bf16 operands, f32 accumulation)
    ref = reference_forward(z_code, categorical, s_code, params)
    for name in ("generated", "validity", "categorical", "S"):
        assert jnp.allclose(result[name], ref[name], atol=5e-2, rtol=5e-2), name

    print("KERNEL_OK")
</pallas_src>

<mosaic_0001>
module attributes {stable_mosaic.version = 11 : i64} {
  func.func @infogan_kernel(%arg0: memref<8x128xbf16, #tpu.memory_space<vmem>>, %arg1: memref<4x128x128xbf16, #tpu.memory_space<vmem>>, %arg2: memref<4x128xf32, #tpu.memory_space<vmem>>, %arg3: memref<8x128xf32, #tpu.memory_space<vmem>>, %arg4: memref<8x128xf32, #tpu.memory_space<vmem>>) attributes {dimension_semantics = [], scalar_prefetch = 0 : i64, scratch_operands = 0 : i64, tpu.core_type = #tpu.core_type<tc>} {
    %c0 = arith.constant 0 : index
    %c0_0 = arith.constant 0 : index
    %0 = vector.load %arg0[%c0, %c0_0] : memref<8x128xbf16, #tpu.memory_space<vmem>>, vector<8x128xbf16>
    %c0_1 = arith.constant 0 : index
    %c0_2 = arith.constant 0 : index
    %1 = vector.load %arg2[%c0_1, %c0_2] : memref<4x128xf32, #tpu.memory_space<vmem>>, vector<4x128xf32>
    %c0_3 = arith.constant 0 : index
    %c0_4 = arith.constant 0 : index
    %c0_5 = arith.constant 0 : index
    %2 = vector.load %arg1[%c0_3, %c0_4, %c0_5] : memref<4x128x128xbf16, #tpu.memory_space<vmem>>, vector<1x128x128xbf16>
    %3 = vector.shape_cast %2 : vector<1x128x128xbf16> to vector<128x128xbf16>
    %cst = arith.constant dense<0.000000e+00> : vector<8x128xf32>
    %4 = tpu.matmul %0, %3, %cst {dimension_numbers = #tpu.dot_dimension_numbers<[1], [0], [0], [1], [0, 0, 1, 1], [], []>} : vector<8x128xbf16>, vector<128x128xbf16>, vector<8x128xf32> -> vector<8x128xf32>
    %5 = vector.extract_strided_slice %1 {offsets = [0, 0], sizes = [1, 128], strides = [1, 1]} : vector<4x128xf32> to vector<1x128xf32>
    %6 = vector.broadcast %5 : vector<1x128xf32> to vector<8x128xf32>
    %7 = arith.addf %4, %6 : vector<8x128xf32>
    %cst_6 = arith.constant 0.000000e+00 : f32
    %8 = vector.broadcast %cst_6 : f32 to vector<8x128xf32>
    %9 = arith.maximumf %7, %8 : vector<8x128xf32>
    %10 = arith.truncf %9 : vector<8x128xf32> to vector<8x128xbf16>
    %c1 = arith.constant 1 : index
    %c0_7 = arith.constant 0 : index
    %c0_8 = arith.constant 0 : index
    %11 = vector.load %arg1[%c1, %c0_7, %c0_8] : memref<4x128x128xbf16, #tpu.memory_space<vmem>>, vector<1x128x128xbf16>
    %12 = vector.shape_cast %11 : vector<1x128x128xbf16> to vector<128x128xbf16>
    %cst_9 = arith.constant dense<0.000000e+00> : vector<8x128xf32>
    %13 = tpu.matmul %10, %12, %cst_9 {dimension_numbers = #tpu.dot_dimension_numbers<[1], [0], [0], [1], [0, 0, 1, 1], [], []>} : vector<8x128xbf16>, vector<128x128xbf16>, vector<8x128xf32> -> vector<8x128xf32>
    %14 = vector.extract_strided_slice %1 {offsets = [1, 0], sizes = [1, 128], strides = [1, 1]} : vector<4x128xf32> to vector<1x128xf32>
    %15 = vector.broadcast %14 : vector<1x128xf32> to vector<8x128xf32>
    %16 = arith.addf %13, %15 : vector<8x128xf32>
    %c0_10 = arith.constant 0 : index
    %c0_11 = arith.constant 0 : index
    %17 = vector.load %arg3[%c0_10, %c0_11] : memref<8x128xf32, #tpu.memory_space<vmem>>, vector<8x128xf32>
    tpu.vector_store %arg3[%c0_10, %c0_11], %16 {strides = array<i32>} : memref<8x128xf32, #tpu.memory_space<vmem>>, vector<8x128xf32>,
    %18 = arith.truncf %16 : vector<8x128xf32> to vector<8x128xbf16>
    %c2 = arith.constant 2 : index
    %c0_12 = arith.constant 0 : index
    %c0_13 = arith.constant 0 : index
    %19 = vector.load %arg1[%c2, %c0_12, %c0_13] : memref<4x128x128xbf16, #tpu.memory_space<vmem>>, vector<1x128x128xbf16>
    %20 = vector.shape_cast %19 : vector<1x128x128xbf16> to vector<128x128xbf16>
    %cst_14 = arith.constant dense<0.000000e+00> : vector<8x128xf32>
    %21 = tpu.matmul %18, %20, %cst_14 {dimension_numbers = #tpu.dot_dimension_numbers<[1], [0], [0], [1], [0, 0, 1, 1], [], []>} : vector<8x128xbf16>, vector<128x128xbf16>, vector<8x128xf32> -> vector<8x128xf32>
    %22 = vector.extract_strided_slice %1 {offsets = [2, 0], sizes = [1, 128], strides = [1, 1]} : vector<4x128xf32> to vector<1x128xf32>
    %23 = vector.broadcast %22 : vector<1x128xf32> to vector<8x128xf32>
    %24 = arith.addf %21, %23 : vector<8x128xf32>
    %cst_15 = arith.constant 0.000000e+00 : f32
    %25 = vector.broadcast %cst_15 : f32 to vector<8x128xf32>
    %26 = arith.maximumf %24, %25 : vector<8x128xf32>
    %27 = arith.truncf %26 : vector<8x128xf32> to vector<8x128xbf16>
    %c3 = arith.constant 3 : index
    %c0_16 = arith.constant 0 : index
    %c0_17 = arith.constant 0 : index
    %28 = vector.load %arg1[%c3, %c0_16, %c0_17] : memref<4x128x128xbf16, #tpu.memory_space<vmem>>, vector<1x128x128xbf16>
    %29 = vector.shape_cast %28 : vector<1x128x128xbf16> to vector<128x128xbf16>
    %cst_18 = arith.constant dense<0.000000e+00> : vector<8x128xf32>
    %30 = tpu.matmul %27, %29, %cst_18 {dimension_numbers = #tpu.dot_dimension_numbers<[1], [0], [0], [1], [0, 0, 1, 1], [], []>} : vector<8x128xbf16>, vector<128x128xbf16>, vector<8x128xf32> -> vector<8x128xf32>
    %31 = vector.extract_strided_slice %1 {offsets = [3, 0], sizes = [1, 128], strides = [1, 1]} : vector<4x128xf32> to vector<1x128xf32>
    %32 = vector.broadcast %31 : vector<1x128xf32> to vector<8x128xf32>
    %33 = arith.addf %30, %32 : vector<8x128xf32>
    %34 = tpu.iota {dimensions = array<i32: 1>} : vector<8x128xi32>
    %c0_i32 = arith.constant 0 : i32
    %35 = vector.broadcast %c0_i32 : i32 to vector<8x128xi32>
    %36 = arith.cmpi eq, %34, %35 : vector<8x128xi32>
    %c1_i32 = arith.constant 1 : i32
    %37 = vector.broadcast %c1_i32 : i32 to vector<8x128xi32>
    %38 = arith.cmpi sge, %34, %37 : vector<8x128xi32>
    %c9_i32 = arith.constant 9 : i32
    %39 = vector.broadcast %c9_i32 : i32 to vector<8x128xi32>
    %40 = arith.cmpi slt, %34, %39 : vector<8x128xi32>
    %41 = arith.andi %38, %40 : vector<8x128xi1>
    %c9_i32_19 = arith.constant 9 : i32
    %42 = vector.broadcast %c9_i32_19 : i32 to vector<8x128xi32>
    %43 = arith.cmpi sge, %34, %42 : vector<8x128xi32>
    %c13_i32 = arith.constant 13 : i32
    %44 = vector.broadcast %c13_i32 : i32 to vector<8x128xi32>
    %45 = arith.cmpi slt, %34, %44 : vector<8x128xi32>
    %46 = arith.andi %43, %45 : vector<8x128xi1>
    %cst_20 = arith.constant 0.000000e+00 : f32
    %47 = vector.broadcast %cst_20 : f32 to vector<8x128xf32>
    %48 = arith.subf %47, %33 : vector<8x128xf32>
    %49 = math.exp %48 : vector<8x128xf32>
    %cst_21 = arith.constant 1.000000e+00 : f32
    %50 = vector.broadcast %cst_21 : f32 to vector<8x128xf32>
    %51 = arith.addf %50, %49 : vector<8x128xf32>
    %cst_22 = arith.constant 1.000000e+00 : f32
    %52 = vector.broadcast %cst_22 : f32 to vector<8x128xf32>
    %53 = arith.divf %52, %51 : vector<8x128xf32>
    %cst_23 = arith.constant -1.000000e+30 : f32
    %54 = vector.broadcast %cst_23 : f32 to vector<8x128xf32>
    %55 = arith.select %41, %33, %54 : vector<8x128xi1>, vector<8x128xf32>
    %cst_24 = arith.constant dense<0xFF800000> : vector<8xf32>
    %56 = vector.multi_reduction <maximumf>, %55, %cst_24 [1] : vector<8x128xf32> to vector<8xf32>
    %57 = vector.shape_cast %56 : vector<8xf32> to vector<8x1xf32>
    %58 = vector.broadcast %57 : vector<8x1xf32> to vector<8x128xf32>
    %59 = arith.subf %55, %58 : vector<8x128xf32>
    %60 = math.exp %59 : vector<8x128xf32>
    %cst_25 = arith.constant 0.000000e+00 : f32
    %61 = vector.broadcast %cst_25 : f32 to vector<8x128xf32>
    %62 = arith.select %41, %60, %61 : vector<8x128xi1>, vector<8x128xf32>
    %cst_26 = arith.constant dense<0.000000e+00> : vector<8xf32>
    %63 = vector.multi_reduction <add>, %62, %cst_26 [1] : vector<8x128xf32> to vector<8xf32>
    %64 = vector.shape_cast %63 : vector<8xf32> to vector<8x1xf32>
    %65 = vector.broadcast %64 : vector<8x1xf32> to vector<8x128xf32>
    %66 = arith.divf %62, %65 : vector<8x128xf32>
    %cst_27 = arith.constant 0.000000e+00 : f32
    %67 = vector.broadcast %cst_27 : f32 to vector<8x128xf32>
    %68 = arith.select %46, %33, %67 : vector<8x128xi1>, vector<8x128xf32>
    %69 = arith.select %41, %66, %68 : vector<8x128xi1>, vector<8x128xf32>
    %70 = arith.select %36, %53, %69 : vector<8x128xi1>, vector<8x128xf32>
    %c0_28 = arith.constant 0 : index
    %c0_29 = arith.constant 0 : index
    %71 = vector.load %arg4[%c0_28, %c0_29] : memref<8x128xf32, #tpu.memory_space<vmem>>, vector<8x128xf32>
    tpu.vector_store %arg4[%c0_28, %c0_29], %70 {strides = array<i32>} : memref<8x128xf32, #tpu.memory_space<vmem>>, vector<8x128xf32>,
    return
  }
}

</mosaic_0001>

<bundles_post_ra>
// kernel: tpu_custom_call.1
= control target key start
LH: loop header
LB: loop body
LE: loop exit
PB: predicated region body
PF: predicated region fallthrough
CT: control target
= control target key end

     0   :  { %10 = vsyncpa [#allocation3], 0  ;;  %s981_s0 = inlined_call_operand.hbm [shape: bf16[8,128], index: 0, kind: input, shape index: {}]   ;;  %s982_s1 = inlined_call_operand.hbm [shape: bf16[4,128,128], index: 1, kind: input, shape index: {}]   ;;  %s983_s2 = inlined_call_operand.vmem [shape: f32[4,128], index: 2, kind: input, shape index: {}]   ;;  %s984_s3 = inlined_call_operand.hbm [shape: f32[8,128], index: 3, kind: output, shape index: {0}]   ;;  %s985_s4 = inlined_call_operand.hbm [shape: f32[8,128], index: 4, kind: output, shape index: {1}]  }
   0x1   :  { %11 = vsyncpa [#allocation6], 0 }
   0x2   :  { %12 = vsyncpa [#allocation4], 0 }
   0x3   :  { %13 = vsyncpa [#allocation9], 0  ;;  %s840_s15 = smov [#allocation2]   ;;  %s841_s17 = smov [#allocation5]  }
   0x4   :  { %s20_s16 = sshll.u32 %s840_s15, 4  ;;  %s29_s18 = sshll.u32 %s841_s17, 4  ;;  %s21_s16 = int_to_ptr.vmem [resolvable:$true] %s20_s16  ;;  %s873_s18 = int_to_ptr.vmem [resolvable:$true] %s29_s18 }
   0x5   :  { %s744_s21 = scalar_lea.hbm %s981_s0, 64 }
   0x6   :  { %p745_p0 = scmp.ne.s32.totalorder %s981_s0, %s744_s21  ;;  %p748_p1 = scmp.lt.u32.totalorder %s744_s21, %s981_s0 }
   0x8   :  { %p750_p2 = pnand %p748_p1, %p745_p0 }
   0xa   :  { %753 = shalt.err (!%p750_p2)
}
   0xb   :  { %s754_s26 = scalar_lea.vmem %s21_s16, 64  ;;  %p759_p4 = scmp.lt.s32.totalorder %s21_s16, %s21_s16 }
   0xc   :  { %p755_p3 = scmp.ne.s32.totalorder %s21_s16, %s754_s26  ;;  %p760_p5 = scmp.lt.s32.totalorder %s754_s26, %s754_s26 }
   0xe   :  { %p761_p6 = por %p760_p5, %p759_p4 }
  0x10   :  { %p762_p7 = pnand %p761_p6, %p755_p3 }
  0x12   :  { %765 = shalt.err (!%p762_p7)
}
  0x13   :  { %23 = dma.hbm_to_vmem [thread:$0]  %s981_s0, 64, %s21_s16, [#allocation3]  }
  0x14   :  { %s766_s5 = scalar_lea.hbm %s982_s1, 4096 }
  0x15   :  { %p767_p8 = scmp.ne.s32.totalorder %s982_s1, %s766_s5  ;;  %p770_p9 = scmp.lt.u32.totalorder %s766_s5, %s982_s1 }
  0x17   :  { %p772_p10 = pnand %p770_p9, %p767_p8 }
  0x19   :  { %775 = shalt.err (!%p772_p10)
}
  0x1a   :  { %s776_s10 = scalar_lea.vmem %s873_s18, 4096  ;;  %p781_p12 = scmp.lt.s32.totalorder %s873_s18, %s873_s18 }
  0x1b   :  { %p777_p11 = scmp.ne.s32.totalorder %s873_s18, %s776_s10  ;;  %p782_p13 = scmp.lt.s32.totalorder %s776_s10, %s776_s10 }
  0x1d   :  { %p783_p0 = por %p782_p13, %p781_p12 }
  0x1f   :  { %p784_p1 = pnand %p783_p0, %p777_p11 }
  0x21   :  { %787 = shalt.err (!%p784_p1)
}
  0x22   :  { %s842_s0 = smov 64   ;;  %s843_s11 = smov 4  }
  0x23   :  { %35 = dma.hbm_to_vmem [thread:$0]  %s982_s1, 4096, %s873_s18, [#allocation6], %s842_s0, %s842_s0, %s843_s11  }
  0x24   :  { %832 = dma.done.wait [#allocation3], 64  }
  0x25   :  { %833 = vsyncadd [#allocation3], 4294967232 }
  0x26   :  { %834 = dma.done.wait [#allocation6], 4096  }
  0x27   :  { %835 = vsyncadd [#allocation6], 4294963200  ;;  %v844_v0 = vmov 0.0   ;;  %vm845_vm0 = vmmov 0   ;;  %v704_v1 = vld [vmem:[#allocation5] sm:$0xff]   ;;  %v705_v2 = vld [vmem:[#allocation5 + $0x8] sm:$0xff]   ;;  %v63_v25 = vlaneseq }
  0x28   :  { %616 = vmatprep.subr.bf16.mxu0 %v844_v0  ;;  %632 = vmatprep.mubr.msk.bf16.mxu0 %vm845_vm0, %v844_v0  ;;  %v706_v3 = vld [vmem:[#allocation5 + $0x10] sm:$0xff]   ;;  %v712_v4 = vld [vmem:[#allocation5 + $0x40] sm:$0xff]   ;;  %v707_v5 = vld [vmem:[#allocation5 + $0x18] sm:$0xff]  }
  0x29   :  { %636 = vmatprep.subr.bf16.mxu1 %v844_v0  ;;  %652 = vmatprep.mubr.msk.bf16.mxu1 %vm845_vm0, %v844_v0  ;;  %v713_v6 = vld [vmem:[#allocation5 + $0x48] sm:$0xff]   ;;  %v708_v7 = vld [vmem:[#allocation5 + $0x20] sm:$0xff]   ;;  %v714_v8 = vld [vmem:[#allocation5 + $0x50] sm:$0xff]   ;;  %v64_v26 = vshrl.u32 %v63_v25, 7  ;;  %v489_v63 = vand.u32 127, %v63_v25 }
  0x2a   :  { %617 = vmatpush3.bf16.msra.mxu0 %v704_v1  ;;  %637 = vmatpush3.bf16.msra.mxu1 %v712_v4  ;;  %v709_v9 = vld [vmem:[#allocation5 + $0x28] sm:$0xff]   ;;  %v715_v10 = vld [vmem:[#allocation5 + $0x58] sm:$0xff]   ;;  %v710_v11 = vld [vmem:[#allocation5 + $0x30] sm:$0xff]  }
  0x2b   :  { %618 = vmatprep.subr.bf16.mxu0 %v844_v0  ;;  %638 = vmatprep.subr.bf16.mxu1 %v844_v0  ;;  %v716_v12 = vld [vmem:[#allocation5 + $0x60] sm:$0xff]   ;;  %v711_v13 = vld [vmem:[#allocation5 + $0x38] sm:$0xff]   ;;  %v717_v14 = vld [vmem:[#allocation5 + $0x68] sm:$0xff]   ;;  %v65_v27 = vsub.s32 0, %v64_v26  ;;  %v176_v44 = vsub.s32 1, %v64_v26  ;;  %v287_v54 = vsub.s32 2, %v64_v26 }
  0x2c   :  { %v45_v15 = vld [vmem:[#allocation2] sm:$0xf]  ;;  %v718_v16 = vld [vmem:[#allocation5 + $0x70] sm:$0xff]   ;;  %v720_v18 = vld [vmem:[#allocation5 + $0x80] sm:$0xff]   ;;  %v398_v1 = vsub.s32 3, %v64_v26  ;;  %vm491_vm1 = vcmp.ge.s32.totalorder %v489_v63, 1 }
  0x2d   :  { %v719_v17 = vld [vmem:[#allocation5 + $0x78] sm:$0xff]   ;;  %v721_v19 = vld [vmem:[#allocation5 + $0x88] sm:$0xff]   ;;  %v722_v20 = vld [vmem:[#allocation5 + $0x90] sm:$0xff]   ;;  %vm492_vm2 = vcmp.lt.s32.totalorder %v489_v63, 9 }
  0x2e   :  { %619 = vmatpush3.bf16.msra.mxu0 %v705_v2  ;;  %639 = vmatpush3.bf16.msra.mxu1 %v713_v6  ;;  %v723_v21 = vld [vmem:[#allocation5 + $0x98] sm:$0xff]   ;;  %v724_v22 = vld [vmem:[#allocation5 + $0xa0] sm:$0xff]   ;;  %v725_v23 = vld [vmem:[#allocation5 + $0xa8] sm:$0xff]  }
  0x2f   :  { %620 = vmatprep.subr.bf16.mxu0 %v844_v0  ;;  %640 = vmatprep.subr.bf16.mxu1 %v844_v0  ;;  %v726_v24 = vld [vmem:[#allocation5 + $0xb0] sm:$0xff]   ;;  %v46_v28 = vld [vmem:[%s983_s2] sm:$0xf]  ;;  %v728_v38 = vld [vmem:[#allocation5 + $0xc0] sm:$0xff]   ;;  %s846_s2 = smov [#allocation7]  }
  0x30   :  { %v66_v29 = vrot.slane %v46_v28, %v65_v27  ;;  %v727_v37 = vld [vmem:[#allocation5 + $0xb8] sm:$0xff]   ;;  %v729_v39 = vld [vmem:[#allocation5 + $0xc8] sm:$0xff]   ;;  %v730_v40 = vld [vmem:[#allocation5 + $0xd0] sm:$0xff]   ;;  %v177_v45 = vrot.slane %v46_v28, %v176_v44  ;;  %v288_v55 = vrot.slane %v46_v28, %v287_v54  ;;  %v399_v2 = vrot.slane %v46_v28, %v398_v1  ;;  %s524_s15 = sshll.u32 %s846_s2, 4  ;;  %s525_s15 = int_to_ptr.vmem [resolvable:$true] %s524_s15 }
  0x31   :  { %v731_v41 = vld [vmem:[#allocation5 + $0xd8] sm:$0xff]   ;;  %v732_v42 = vld [vmem:[#allocation5 + $0xe0] sm:$0xff]   ;;  %v733_v43 = vld [vmem:[#allocation5 + $0xe8] sm:$0xff]   ;;  %s788_s16 = scalar_lea.vmem %s525_s15, 128  ;;  %p793_p3 = scmp.lt.s32.totalorder %s525_s15, %s525_s15 }
  0x32   :  { %621 = vmatpush3.bf16.msra.mxu0 %v706_v3  ;;  %641 = vmatpush3.bf16.msra.mxu1 %v714_v8  ;;  %v734_v52 = vld [vmem:[#allocation5 + $0xf0] sm:$0xff]   ;;  %v735_v53 = vld [vmem:[#allocation5 + $0xf8] sm:$0xff]   ;;  %vm947_vm3 = vmand %vm491_vm1, %vm492_vm2  ;;  %p789_p2 = scmp.ne.s32.totalorder %s525_s15, %s788_s16  ;;  %p794_p4 = scmp.lt.s32.totalorder %s788_s16, %s788_s16 }
  0x33   :  { %622 = vmatprep.subr.bf16.mxu0 %v844_v0  ;;  %642 = vmatprep.subr.bf16.mxu1 %v844_v0 }
  0x34   :  { %p795_p5 = por %p794_p4, %p793_p3 }
  0x36   :  { %623 = vmatpush3.bf16.msra.mxu0 %v707_v5  ;;  %643 = vmatpush3.bf16.msra.mxu1 %v715_v10  ;;  %p796_p6 = pnand %p795_p5, %p789_p2 }
  0x37   :  { %624 = vmatprep.subr.bf16.mxu0 %v844_v0  ;;  %644 = vmatprep.subr.bf16.mxu1 %v844_v0 }
  0x3a   :  { %625 = vmatpush3.bf16.msra.mxu0 %v708_v7  ;;  %645 = vmatpush3.bf16.msra.mxu1 %v716_v12 }
  0x3b   :  { %626 = vmatprep.subr.bf16.mxu0 %v844_v0  ;;  %646 = vmatprep.subr.bf16.mxu1 %v844_v0 }
  0x3e   :  { %627 = vmatpush3.bf16.msra.mxu0 %v709_v9  ;;  %647 = vmatpush3.bf16.msra.mxu1 %v717_v14 }
  0x3f   :  { %628 = vmatprep.subr.bf16.mxu0 %v844_v0  ;;  %648 = vmatprep.subr.bf16.mxu1 %v844_v0 }
  0x42   :  { %629 = vmatpush3.bf16.msra.mxu0 %v710_v11  ;;  %649 = vmatpush3.bf16.msra.mxu1 %v718_v16 }
  0x43   :  { %630 = vmatprep.subr.bf16.mxu0 %v844_v0  ;;  %650 = vmatprep.subr.bf16.mxu1 %v844_v0 }
  0x46   :  { %631 = vmatpush3.bf16.msra.mxu0 %v711_v13  ;;  %651 = vmatpush3.bf16.msra.mxu1 %v719_v17 }
  0x47   :  { %656 = vmatprep.subr.bf16.mxu0 %v844_v0  ;;  %676 = vmatprep.subr.bf16.mxu1 %v844_v0 }
  0x49   :  { %633 = vmatmul.mubr.bf16.vlgmr.msra.gmra.mrb[0].mxu0 %v45_v15 }
  0x4a   :  { %672 = vmatprep.mubr.msk.bf16.mxu0 %vm845_vm0, %v844_v0  ;;  %657 = vmatpush3.bf16.msra.mxu0 %v720_v18 }
  0x4b   :  { %658 = vmatprep.subr.bf16.mxu0 %v844_v0 }
  0x4e   :  { %659 = vmatpush3.bf16.msra.mxu0 %v721_v19 }
  0x4f   :  { %660 = vmatprep.subr.bf16.mxu0 %v844_v0 }
  0x52   :  { %661 = vmatpush3.bf16.msra.mxu0 %v722_v20 }
  0x53   :  { %662 = vmatprep.subr.bf16.mxu0 %v844_v0 }
  0x56   :  { %663 = vmatpush3.bf16.msra.mxu0 %v723_v21 }
  0x57   :  { %664 = vmatprep.subr.bf16.mxu0 %v844_v0 }
  0x5a   :  { %665 = vmatpush3.bf16.msra.mxu0 %v724_v22 }
  0x5b   :  { %666 = vmatprep.subr.bf16.mxu0 %v844_v0 }
  0x5e   :  { %667 = vmatpush3.bf16.msra.mxu0 %v725_v23 }
  0x5f   :  { %668 = vmatprep.subr.bf16.mxu0 %v844_v0 }
  0x62   :  { %669 = vmatpush3.bf16.msra.mxu0 %v726_v24 }
  0x63   :  { %670 = vmatprep.subr.bf16.mxu0 %v844_v0 }
  0x66   :  { %671 = vmatpush3.bf16.msra.mxu0 %v727_v37 }
 0x11c   :  { %v149_v30 = vpop.f32.mrb[0].mxu0 }
 0x11d   :  { %v150_v31 = vadd.f32 %v149_v30, %v66_v29  ;;  %v634_v32 = vpop.f32.mrb[1].mxu0 }
 0x11e   :  { %v152_v33 = vpop.f32.mrb[2].mxu0 }
 0x11f   :  { %v155_v34 = vmax.f32 %v150_v31, 0.0  ;;  %v635_v35 = vpop.f32.mrb[3].mxu0 }
 0x121   :  { %v156_v36 = vpack.c.bf16 %v155_v34, %v155_v34 }
 0x123   :  { %653 = vmatmul.mubr.bf16.vlgmr.msra.gmra.mrb[0].mxu1 %v156_v36 }
 0x124   :  { %692 = vmatprep.mubr.msk.bf16.mxu1 %vm845_vm0, %v844_v0  ;;  %677 = vmatpush3.bf16.msra.mxu1 %v728_v38 }
 0x125   :  { %678 = vmatprep.subr.bf16.mxu1 %v844_v0 }
 0x128   :  { %679 = vmatpush3.bf16.msra.mxu1 %v729_v39 }
 0x129   :  { %680 = vmatprep.subr.bf16.mxu1 %v844_v0 }
 0x12c   :  { %681 = vmatpush3.bf16.msra.mxu1 %v730_v40 }
 0x12d   :  { %682 = vmatprep.subr.bf16.mxu1 %v844_v0 }
 0x130   :  { %683 = vmatpush3.bf16.msra.mxu1 %v731_v41 }
 0x131   :  { %684 = vmatprep.subr.bf16.mxu1 %v844_v0 }
 0x134   :  { %685 = vmatpush3.bf16.msra.mxu1 %v732_v42 }
 0x135   :  { %686 = vmatprep.subr.bf16.mxu1 %v844_v0 }
 0x138   :  { %687 = vmatpush3.bf16.msra.mxu1 %v733_v43 }
 0x139   :  { %688 = vmatprep.subr.bf16.mxu1 %v844_v0 }
 0x13c   :  { %689 = vmatpush3.bf16.msra.mxu1 %v734_v52 }
 0x13d   :  { %690 = vmatprep.subr.bf16.mxu1 %v844_v0 }
 0x140   :  { %691 = vmatpush3.bf16.msra.mxu1 %v735_v53 }
 0x1f6   :  { %v260_v46 = vpop.f32.mrb[0].mxu1 }
 0x1f7   :  { %v261_v47 = vadd.f32 %v260_v46, %v177_v45  ;;  %v654_v48 = vpop.f32.mrb[1].mxu1 }
 0x1f8   :  { %v263_v49 = vpop.f32.mrb[2].mxu1 }
 0x1f9   :  { %v267_v50 = vpack.c.bf16 %v261_v47, %v261_v47  ;;  %266 = vst [vmem:[#allocation7] sm:$0xff] %v261_v47  ;;  %v655_v51 = vpop.f32.mrb[3].mxu1 }
 0x1fb   :  { %673 = vmatmul.mubr.bf16.vlgmr.msra.gmra.mrb[4].mxu0 %v267_v50 }
 0x2ce   :  { %v371_v56 = vpop.f32.mrb[4].mxu0 }
 0x2cf   :  { %v372_v57 = vadd.f32 %v371_v56, %v288_v55  ;;  %v674_v58 = vpop.f32.mrb[5].mxu0 }
 0x2d0   :  { %v374_v59 = vpop.f32.mrb[6].mxu0 }
 0x2d1   :  { %v377_v60 = vmax.f32 %v372_v57, 0.0  ;;  %v675_v61 = vpop.f32.mrb[7].mxu0 }
 0x2d3   :  { %v378_v62 = vpack.c.bf16 %v377_v60, %v377_v60 }
 0x2d5   :  { %693 = vmatmul.mubr.bf16.vlgmr.msra.gmra.mrb[4].mxu1 %v378_v62 }
 0x3a8   :  { %v482_v3 = vpop.f32.mrb[4].mxu1 }
 0x3a9   :  { %v483_v4 = vadd.f32 %v482_v3, %v399_v2  ;;  %v694_v5 = vpop.f32.mrb[5].mxu1 }
 0x3aa   :  { %v485_v6 = vpop.f32.mrb[6].mxu1 }
 0x3ab   :  { %v695_v7 = vpop.f32.mrb[7].mxu1  ;;  %v503_v8 = vsel %vm947_vm3, %v483_v4, -1e+30 }
 0x3ac   :  { %504 = vmax.xlane.f32.xlu0 %v503_v8 }
 0x439   :  { %v505_v9 = vpop.xlane.xlu0 %504 }
 0x43a   :  { %v506_v10 = vsub.f32 %v503_v8, %v505_v9 }
 0x43c   :  { %v507_v11 = vmul.f32 1.442695, %v506_v10 }
 0x43e   :  { %736 = vpow2.f32 %v507_v11 }
 0x448   :  { %v737_v12 = vpop.eup %736 }
 0x449   :  { %v509_v13 = vsel %vm947_vm3, %v737_v12, 0.0 }
 0x44a   :  { %510 = vadd.xlane.f32.xlu0 %v509_v13 }
 0x44b   :  { %799 = shalt.err (!%p796_p6)
}
 0x44c   :  { %s800_s19 = scalar_lea.hbm %s984_s3, 128 }
 0x44d   :  { %p801_p7 = scmp.ne.s32.totalorder %s984_s3, %s800_s19  ;;  %p804_p8 = scmp.lt.u32.totalorder %s800_s19, %s984_s3 }
 0x44f   :  { %p806_p9 = pnand %p804_p8, %p801_p7 }
 0x451   :  { %809 = shalt.err (!%p806_p9)
}
 0x452   :  { %527 = dma.vmem_to_hbm [thread:$0]  %s525_s15, 128, %s984_s3, [#allocation4]   ;;  %v497_v14 = vsub.f32 0.0, %v483_v4  ;;  %vm494_vm4 = vcmp.ge.s32.totalorder %v489_v63, 9  ;;  %vm495_vm5 = vcmp.lt.s32.totalorder %v489_v63, 13  ;;  %vm490_vm7 = vcmp.eq.s32.totalorder %v489_v63, 0 }
 0x453   :  { %vm496_vm6 = vmand %vm494_vm4, %vm495_vm5  ;;  %s847_s26 = smov [#allocation8]  }
 0x454   :  { %v498_v15 = vmul.f32 1.442695, %v497_v14  ;;  %s534_s27 = sshll.u32 %s847_s26, 4  ;;  %v514_v21 = vsel %vm496_vm6, %v483_v4, 0.0  ;;  %s535_s27 = int_to_ptr.vmem [resolvable:$true] %s534_s27 }
 0x455   :  { %s810_s3 = scalar_lea.vmem %s535_s27, 128  ;;  %p815_p11 = scmp.lt.s32.totalorder %s535_s27, %s535_s27 }
 0x456   :  { %738 = vpow2.f32 %v498_v15  ;;  %p811_p10 = scmp.ne.s32.totalorder %s535_s27, %s810_s3  ;;  %p816_p12 = scmp.lt.s32.totalorder %s810_s3, %s810_s3 }
 0x458   :  { %p817_p13 = por %p816_p12, %p815_p11 }
 0x45a   :  { %p818_p0 = pnand %p817_p13, %p811_p10 }
 0x460   :  { %v739_v16 = vpop.eup %738 }
 0x461   :  { %v500_v17 = vadd.f32 1.0, %v739_v16 }
 0x4d7   :  { %v511_v18 = vpop.xlane.xlu0 %510 }
 0x4d8   :  { %740 = vrcp.f32 %v511_v18 }
 0x4d9   :  { %742 = vrcp.f32 %v500_v17 }
 0x4e2   :  { %v741_v19 = vpop.eup %740 }
 0x4e3   :  { %v513_v20 = vmul.f32 %v741_v19, %v509_v13  ;;  %v743_v22 = vpop.eup %742 }
 0x4e5   :  { %v515_v23 = vsel %vm947_vm3, %v513_v20, %v514_v21 }
 0x4e6   :  { %v516_v24 = vsel %vm490_vm7, %v743_v22, %v515_v23 }
 0x4e7   :  { %517 = vst [vmem:[#allocation8] sm:$0xff] %v516_v24 }
 0x4e8   :  { %821 = shalt.err (!%p818_p0)
}
 0x4e9   :  { %s822_s30 = scalar_lea.hbm %s985_s4, 128 }
 0x4ea   :  { %p823_p1 = scmp.ne.s32.totalorder %s985_s4, %s822_s30  ;;  %p826_p2 = scmp.lt.u32.totalorder %s822_s30, %s985_s4 }
 0x4ec   :  { %p828_p3 = pnand %p826_p2, %p823_p1 }
 0x4ee   :  { %831 = shalt.err (!%p828_p3)
}
 0x4ef   :  { %537 = dma.vmem_to_hbm [thread:$0]  %s535_s27, 128, %s985_s4, [#allocation9]  }
 0x4f0   :  { %836 = dma.done.wait [#allocation4], 128  }
 0x4f1   :  { %837 = vsyncadd [#allocation4], 4294967168 }
 0x4f2   :  { %838 = dma.done.wait [#allocation9], 128  }
 0x4f3   :  { %839 = vsyncadd [#allocation9], 4294967168 }
 0x4f4   :  { %544 = vsyncpa [#allocation3], 1 }
 0x4f5   :  { %545 = vsyncpa [#allocation6], 1 }
 0x4f6   :  { %546 = vsyncpa [#allocation4], 1 }
 0x4f7   :  { %547 = vsyncpa [#allocation9], 1 }

</bundles_post_ra>
